<compile_context>
chip_gen: v6e
topology: v6e:2x2x1
jax: 0.10.0
libtpu: 0.0.40
codegen_flags: <defaults>
</compile_context>

<pallas_src>
import functools

import jax
import jax.numpy as jnp
from jax.experimental import pallas as pl
from jax.experimental.pallas import tpu as pltpu
import numpy as np


def _cdiv(a, b):
    return (a + b - 1) // b


# --------------------------------------------------------------------------------------
# Linear layer: y = x @ W (+ b)      (W stored as (in, out) == PyTorch weight transposed)
# --------------------------------------------------------------------------------------
def _linear_bias_kernel(x_ref, w_ref, b_ref, o_ref):
    # x: (tile_m, Cin) f32/bf16 ; w: (Cin, N) bf16 ; b: (1, N) f32.  bf16 MXU, f32 accum.
    acc = jnp.dot(x_ref[...].astype(jnp.bfloat16), w_ref[...],
                  preferred_element_type=jnp.float32)
    o_ref[...] = (acc + b_ref[...]).astype(o_ref.dtype)


def _linear_nobias_kernel(x_ref, w_ref, o_ref):
    acc = jnp.dot(x_ref[...].astype(jnp.bfloat16), w_ref[...],
                  preferred_element_type=jnp.float32)
    o_ref[...] = acc.astype(o_ref.dtype)


def linear_pallas(x2d, w, b=None, *, tile_m=512, out_dtype=jnp.float32):
    """x2d: (M, Cin) ; w: (Cin, N) f32 ; b: (N,) f32 or None  ->  (M, N) out_dtype."""
    M, Cin = x2d.shape
    N = w.shape[1]

    # Row tiling only; full-N (lane-dense) column tile keeps the MXU fed and fetches
    # each row tile of x exactly once.
    tile_m = min(tile_m, _cdiv(M, 8) * 8)
    M_pad = _cdiv(M, tile_m) * tile_m
    if M_pad != M:
        x2d = jnp.pad(x2d, ((0, M_pad - M), (0, 0)))

    w_bf = w.astype(jnp.bfloat16)          # small & reused across row tiles: cast once
    grid = (M_pad // tile_m,)

    x_spec = pl.BlockSpec((tile_m, Cin), lambda i: (i, 0))
    w_spec = pl.BlockSpec((Cin, N), lambda i: (0, 0))
    out_spec = pl.BlockSpec((tile_m, N), lambda i: (i, 0))

    flops = 2 * M_pad * Cin * N
    bytes_accessed = int(M_pad * Cin * x2d.dtype.itemsize + Cin * N * 2
                         + M_pad * N * jnp.dtype(out_dtype).itemsize + N * 4)
    cp = pltpu.CompilerParams(dimension_semantics=("parallel",),
                              vmem_limit_bytes=48 * 1024 * 1024)
    ce = pl.CostEstimate(flops=int(flops), transcendentals=0, bytes_accessed=bytes_accessed)

    # NOTE: Cin is small in this model so the reduction axis is not split; for large Cin
    # add an 'arbitrary' grid axis with a VMEM f32 accumulator (pl.when init/finalize).
    if b is None:
        out = pl.pallas_call(
            _linear_nobias_kernel,
            out_shape=jax.ShapeDtypeStruct((M_pad, N), out_dtype),
            grid_spec=pltpu.PrefetchScalarGridSpec(
                num_scalar_prefetch=0, grid=grid,
                in_specs=[x_spec, w_spec], out_specs=out_spec),
            compiler_params=cp, cost_estimate=ce,
        )(x2d, w_bf)
    else:
        b2d = b.reshape(1, N).astype(jnp.float32)
        out = pl.pallas_call(
            _linear_bias_kernel,
            out_shape=jax.ShapeDtypeStruct((M_pad, N), out_dtype),
            grid_spec=pltpu.PrefetchScalarGridSpec(
                num_scalar_prefetch=0, grid=grid,
                in_specs=[x_spec, w_spec, pl.BlockSpec((1, N), lambda i: (0, 0))],
                out_specs=out_spec),
            compiler_params=cp, cost_estimate=ce,
        )(x2d, w_bf, b2d)
    return out[:M] if M_pad != M else out


# --------------------------------------------------------------------------------------
# Windowed attention: per (window, head) softmax(q k^T * scale + key_bias) @ v
# --------------------------------------------------------------------------------------
def _window_attn_kernel(q_ref, k_ref, v_ref, bias_ref, o_ref, *, scale, num_heads):
    # q/k/v blocks: (1, TP, K, C) bf16 ; bias: (TP, K) f32 additive key bias (0 / -1e30)
    # o block     : (1, TP, K, C) bf16
    C = q_ref.shape[-1]
    g = num_heads
    dh = C // g

    q = q_ref[0]                                   # (TP, K, C) bf16
    k = k_ref[0]
    v = v_ref[0]
    neg = bias_ref[...][:, None, :]                # (TP, 1, K): add along the key axis
    valid = (neg > -1e20).astype(jnp.float32)      # only matters for fully-masked windows

    outs = []
    for h in range(g):                             # static head loop (g=1 in default cfg)
        sl = slice(h * dh, (h + 1) * dh)
        s = jax.lax.dot_general(q[..., sl], k[..., sl],
                                (((2,), (2,)), ((0,), (0,))),
                                preferred_element_type=jnp.float32)   # (TP, Kq, Kk)
        s = s * scale + neg                        # masked_fill(-inf) as additive bias

        # softmax over keys (== torch softmax(dim=-2) on the (b,g,q,k,p) layout)
        s_max = jnp.max(s, axis=-1, keepdims=True)
        p = jnp.exp(s - s_max) * valid             # masked_fill(0) after softmax
        denom = jnp.sum(p, axis=-1, keepdims=True)
        denom = jnp.where(denom <= 0.0, 1.0, denom)   # fully-masked window -> zero weights
        p = p * pl.reciprocal(denom, approx=True)

        outs.append(jax.lax.dot_general(p.astype(jnp.bfloat16), v[..., sl],
                                        (((2,), (1,)), ((0,), (0,))),
                                        preferred_element_type=jnp.float32))  # (TP, Kq, dh)

    o = outs[0] if g == 1 else jnp.concatenate(outs, axis=-1)
    o_ref[0] = o.astype(o_ref.dtype)


def window_attention_pallas(qkv_win, bias, scale, num_heads, *, tile_p=128):
    """qkv_win: (B, P, K, 3C) bf16 (window-major) ; bias: (P, K) f32 additive key bias.
    Returns attention output (B, P, K, C) bf16 in the same window-major layout."""
    B, P, K, C3 = qkv_win.shape
    C = C3 // 3

    if P <= tile_p:
        tp, P_pad = P, P                      # single P tile; grid still parallel over B
    else:
        tp = _cdiv(tile_p, 8) * 8
        P_pad = _cdiv(P, tp) * tp
        if P_pad != P:                        # dummy windows: zero qkv, all keys valid
            qkv_win = jnp.pad(qkv_win, ((0, 0), (0, P_pad - P), (0, 0), (0, 0)))
            bias = jnp.pad(bias, ((0, P_pad - P), (0, 0)))
    grid = (B, P_pad // tp)

    if C % 128 == 0:
        # Lane-dense channel blocking: same HBM buffer passed three times, the channel
        # index_map selects the q / k / v 128-lane block (no XLA slice copies).
        q_arr = k_arr = v_arr = qkv_win
        cq, ck, cv = 0, 1, 2
    else:
        # TODO(synk): non-lane-dense hdim falls back to a wrapper-side channel split.
        q_arr, k_arr, v_arr = (qkv_win[..., :C], qkv_win[..., C:2 * C], qkv_win[..., 2 * C:])
        cq = ck = cv = 0

    kern = functools.partial(_window_attn_kernel, scale=float(scale), num_heads=num_heads)
    flops = 4 * B * P_pad * K * K * C
    bytes_accessed = int(4 * B * P_pad * K * C * 2 + P_pad * K * 4)

    out = pl.pallas_call(
        kern,
        out_shape=jax.ShapeDtypeStruct((B, P_pad, K, C), jnp.bfloat16),
        grid_spec=pltpu.PrefetchScalarGridSpec(
            num_scalar_prefetch=0,
            grid=grid,
            in_specs=[
                pl.BlockSpec((1, tp, K, C), lambda b, i: (b, i, 0, cq)),
                pl.BlockSpec((1, tp, K, C), lambda b, i: (b, i, 0, ck)),
                pl.BlockSpec((1, tp, K, C), lambda b, i: (b, i, 0, cv)),
                pl.BlockSpec((tp, K), lambda b, i: (i, 0)),
            ],
            out_specs=pl.BlockSpec((1, tp, K, C), lambda b, i: (b, i, 0, 0)),
        ),
        compiler_params=pltpu.CompilerParams(
            dimension_semantics=("parallel", "parallel"),   # megacore shards (B, P-tiles)
            vmem_limit_bytes=48 * 1024 * 1024,              # headroom on v7x 64 MiB VMEM
        ),
        cost_estimate=pl.CostEstimate(flops=int(flops),
                                      transcendentals=int(B * P_pad * K * K),
                                      bytes_accessed=bytes_accessed),
    )(q_arr, k_arr, v_arr, bias)
    return out[:, :P] if P_pad != P else out


# --------------------------------------------------------------------------------------
# Layout plumbing (pure reshapes/transposes, done host-side)
# --------------------------------------------------------------------------------------
def window_partition(x_bhwc, ps, *, window_major=False):
    """window_major=False: 'b (sh kh) (sw kw) c -> b (kh kw) (sh sw) c'   (torch layout)
       window_major=True : 'b (sh kh) (sw kw) c -> b (sh sw) (kh kw) c'   (kernel layout)"""
    B, Hp, Wp, C = x_bhwc.shape
    sh, sw = Hp // ps, Wp // ps
    t = x_bhwc.reshape(B, sh, ps, sw, ps, C)
    if window_major:
        t = t.transpose(0, 1, 3, 2, 4, 5)
        return t.reshape(B, sh * sw, ps * ps, C)
    t = t.transpose(0, 2, 4, 1, 3, 5)
    return t.reshape(B, ps * ps, sh * sw, C)


def window_unpartition(x, ps, Hp, Wp, *, window_major=False):
    B, C = x.shape[0], x.shape[-1]
    sh, sw = Hp // ps, Wp // ps
    if window_major:
        t = x.reshape(B, sh, sw, ps, ps, C).transpose(0, 1, 3, 2, 4, 5)
    else:
        t = x.reshape(B, ps, ps, sh, sw, C).transpose(0, 3, 1, 4, 2, 5)
    return t.reshape(B, Hp, Wp, C)


def local_attn_pallas(x, H, W, mask, w_qkv, w_proj, b_proj, *,
                      patch_size=7, num_heads=1, tile_m=512, tile_p=128):
    """
    x: (B, H*W, C) f32 ; mask: (1, 1, H, W), nonzero marks invalid positions (or None).
    w_qkv: (C, 3C) ; w_proj: (C, C) ; b_proj: (C,)  (weights stored as (in, out)).
    """
    B, L, C = x.shape
    hdim, ps, g = C, patch_size, num_heads
    scale = (hdim // g) ** (-0.5)

    # ---- to_qkv (qkv_bias=False -> no bias); bf16 at the HBM boundary ----
    qkv = linear_pallas(x.reshape(B * L, C), w_qkv, None,
                        tile_m=tile_m, out_dtype=jnp.bfloat16)
    qkv = qkv.reshape(B, H, W, 3 * hdim)

    # ---- to_patch: pad to patch_size multiples, window-partition (window-major) ----
    Hp, Wp = _cdiv(H, ps) * ps, _cdiv(W, ps) * ps
    qkv = jnp.pad(qkv, ((0, 0), (0, Hp - H), (0, Wp - W), (0, 0)))
    qkv = window_partition(qkv, ps, window_major=True)          # (B, P, K, 3C) bf16

    if mask is None:
        mask = jnp.zeros((1, 1, H, W), jnp.float32)
    m = jnp.pad(mask.astype(jnp.float32),
                ((0, 0), (0, 0), (0, Hp - H), (0, Wp - W)), constant_values=1.0)
    m = window_partition(m.transpose(0, 2, 3, 1), ps, window_major=True)[0, ..., 0]  # (P, K)
    key_bias = jnp.where(m > 0, jnp.float32(-1e30), jnp.float32(0.0))                # additive

    # TODO(synk): rel_pos (SwinRelPos/FullRelPos) term is not defined in the spec and is
    # None in the default config; it is treated as zero here.
    o = window_attention_pallas(qkv, key_bias, scale, g, tile_p=tile_p)  # (B, P, K, C) bf16

    # ---- back to image layout, crop, project ----
    o = window_unpartition(o, ps, Hp, Wp, window_major=True)[:, :H, :W, :]
    out = linear_pallas(o.reshape(B * H * W, hdim), w_proj, b_proj,
                        tile_m=tile_m, out_dtype=jnp.float32)
    # TODO(synk): stride_kv>1 (pool_kv) and the dim_qk>0 (to_qk/to_v) branches are not
    # implemented; this covers the default constructor configuration.
    return out.reshape(B, H * W, hdim)


# --------------------------------------------------------------------------------------
# Pure-JAX f32 reference (mirrors the PyTorch forward)
# --------------------------------------------------------------------------------------
def local_attn_reference(x, H, W, mask, w_qkv, w_proj, b_proj, *,
                         patch_size=7, num_heads=1):
    B, L, C = x.shape
    ps, g = patch_size, num_heads
    dh = C // g
    scale = dh ** (-0.5)

    qkv = x @ w_qkv
    qkv = qkv.reshape(B, H, W, 3 * C)
    Hp, Wp = _cdiv(H, ps) * ps, _cdiv(W, ps) * ps
    qkv = jnp.pad(qkv, ((0, 0), (0, Hp - H), (0, Wp - W), (0, 0)))
    qkv = window_partition(qkv, ps)                             # (B, K, P, 3C)
    m = jnp.pad(mask.astype(jnp.float32),
                ((0, 0), (0, 0), (0, Hp - H), (0, Wp - W)), constant_values=1.0)
    m = window_partition(m.transpose(0, 2, 3, 1), ps)[..., 0]   # (1, K, P)

    K = ps * ps
    P = (Hp // ps) * (Wp // ps)
    qkv = qkv.reshape(B, K, P, 3, g, dh)
    q, k, v = qkv[:, :, :, 0], qkv[:, :, :, 1], qkv[:, :, :, 2]

    attn = jnp.einsum('bqpgc,bkpgc->bgqkp', q, k)
    attn = attn * scale
    kb = m[:, None, None, :, :] > 0                             # (1,1,1,K,P)
    attn = jnp.where(kb, -jnp.inf, attn)
    attn = jax.nn.softmax(attn, axis=-2)
    attn = jnp.where(kb, 0.0, attn)
    out = jnp.einsum('bgqkp,bkpgc->bqpgc', attn, v)
    out = out.reshape(B, K, P, C)
    out = window_unpartition(out, ps, Hp, Wp)[:, :H, :W, :]
    out = out.reshape(B, H * W, C)
    return out @ w_proj + b_proj


if __name__ == "__main__":
    B, H, W = 2, 16, 16
    hdim = 128           # out_ch (= hdim with ratio=1); lane-dense channel count
    num_heads = 1
    patch_size = 7

    key = jax.random.PRNGKey(0)
    kx, kq, kp, kb = jax.random.split(key, 4)

    x = jax.random.normal(kx, (B, H * W, hdim), dtype=jnp.float32)

    # Weights stored as (in, out): y = x @ W (+ b)  ==  PyTorch x @ W_pt.T
    w_qkv = jax.random.normal(kq, (hdim, 3 * hdim), dtype=jnp.float32) * 0.05
    w_proj = jax.random.normal(kp, (hdim, hdim), dtype=jnp.float32) * 0.05
    b_proj = jax.random.normal(kb, (hdim,), dtype=jnp.float32) * 0.05

    # mask: (1,1,H,W), nonzero marks invalid key positions (mask the first two columns).
    mask = jnp.zeros((1, 1, H, W), jnp.float32).at[:, :, :, :2].set(1.0)

    out = jax.block_until_ready(
        local_attn_pallas(x, H, W, mask, w_qkv, w_proj, b_proj,
                          patch_size=patch_size, num_heads=num_heads))
    ref = jax.block_until_ready(
        local_attn_reference(x, H, W, mask, w_qkv, w_proj, b_proj,
                             patch_size=patch_size, num_heads=num_heads))

    # bf16 MXU inputs + bf16 HBM boundaries (f32 accumulation) vs f32 reference:
    # expected ~1e-2-level relative error; tolerance set accordingly.
    np.testing.assert_allclose(np.asarray(out), np.asarray(ref), rtol=3e-2, atol=3e-2)

    print("KERNEL_OK")
</pallas_src>

<mosaic_0001>
module attributes {stable_mosaic.version = 11 : i64} {
  func.func @_linear_nobias_kernel(%arg0: i32, %arg1: memref<512x128xf32, #tpu.memory_space<vmem>>, %arg2: memref<128x384xbf16, #tpu.memory_space<vmem>>, %arg3: memref<512x384xbf16, #tpu.memory_space<vmem>>) attributes {dimension_semantics = [#tpu.dimension_semantics<parallel>], iteration_bounds = array<i64: 1>, scalar_prefetch = 0 : i64, scratch_operands = 0 : i64, tpu.core_type = #tpu.core_type<tc>, window_params = [{transform_indices = @transform_0, window_bounds = array<i64: 512, 128>}, {pipeline_mode = #tpu.pipeline_mode<synchronous>, transform_indices = @transform_1, window_bounds = array<i64: 128, 384>}, {transform_indices = @transform_2, window_bounds = array<i64: 512, 384>}]} {
    %c0 = arith.constant 0 : index
    %c0_0 = arith.constant 0 : index
    %0 = vector.load %arg1[%c0, %c0_0] : memref<512x128xf32, #tpu.memory_space<vmem>>, vector<512x128xf32>
    %1 = arith.truncf %0 : vector<512x128xf32> to vector<512x128xbf16>
    %c0_1 = arith.constant 0 : index
    %c0_2 = arith.constant 0 : index
    %2 = vector.load %arg2[%c0_1, %c0_2] : memref<128x384xbf16, #tpu.memory_space<vmem>>, vector<128x384xbf16>
    %cst = arith.constant dense<0.000000e+00> : vector<512x384xf32>
    %3 = tpu.matmul %1, %2, %cst {dimension_numbers = #tpu.dot_dimension_numbers<[1], [0], [0], [1], [0, 0, 1, 1], [], []>} : vector<512x128xbf16>, vector<128x384xbf16>, vector<512x384xf32> -> vector<512x384xf32>
    %4 = arith.truncf %3 : vector<512x384xf32> to vector<512x384xbf16>
    %c0_3 = arith.constant 0 : index
    %c0_4 = arith.constant 0 : index
    %5 = vector.load %arg3[%c0_3, %c0_4] : memref<512x384xbf16, #tpu.memory_space<vmem>>, vector<512x384xbf16>
    tpu.vector_store %arg3[%c0_3, %c0_4], %4 {strides = array<i32>} : memref<512x384xbf16, #tpu.memory_space<vmem>>, vector<512x384xbf16>,
    return
  }
  func.func @transform_0(%arg0: i32) -> (i32, i32) {
    %c0_i32 = arith.constant 0 : i32
    %c0_i32_0 = arith.constant 0 : i32
    return %arg0, %c0_i32 : i32, i32
  }
  func.func @transform_1(%arg0: i32) -> (i32, i32) {
    %c0_i32 = arith.constant 0 : i32
    %c0_i32_0 = arith.constant 0 : i32
    %c0_i32_1 = arith.constant 0 : i32
    return %c0_i32, %c0_i32_0 : i32, i32
  }
  func.func @transform_2(%arg0: i32) -> (i32, i32) {
    %c0_i32 = arith.constant 0 : i32
    %c0_i32_0 = arith.constant 0 : i32
    return %arg0, %c0_i32 : i32, i32
  }
}

</mosaic_0001>

<bundles_post_ra>
// kernel: tpu_custom_call.1
= control target key start
LH: loop header
LB: loop body
LE: loop exit
PB: predicated region body
PF: predicated region fallthrough
CT: control target
= control target key end

     0   :  { %7 = vsyncpa [#allocation3], 0  ;;  %s2361_s0 = inlined_call_operand.hbm [shape: f32[512,128], index: 0, kind: input, shape index: {}]   ;;  %s2362_s1 = inlined_call_operand.hbm [shape: bf16[128,384], index: 1, kind: input, shape index: {}]   ;;  %s2363_s2 = inlined_call_operand.hbm [shape: bf16[512,384], index: 2, kind: output, shape index: {}]  }
   0x1   :  { %8 = vsyncpa [#allocation6], 0 }
   0x2   :  { %9 = vsyncpa [#allocation4], 0  ;;  %s2247_s9 = smov [#allocation2]  }
   0x3   :  { %s15_s10 = sshll.u32 %s2247_s9, 4  ;;  %s16_s10 = int_to_ptr.vmem [resolvable:$true] %s15_s10 }
   0x4   :  { %s2189_s11 = scalar_lea.vmem %s16_s10, 8192  ;;  %p2194_p1 = scmp.lt.s32.totalorder %s16_s10, %s16_s10 }
   0x5   :  { %p2190_p0 = scmp.ne.s32.totalorder %s16_s10, %s2189_s11  ;;  %p2195_p2 = scmp.lt.s32.totalorder %s2189_s11, %s2189_s11 }
   0x7   :  { %p2196_p3 = por %p2195_p2, %p2194_p1 }
   0x9   :  { %p2197_p4 = pnand %p2196_p3, %p2190_p0 }
   0xb   :  { %2200 = shalt.err (!%p2197_p4)
}
   0xc   :  { %s2248_s12 = smov 128   ;;  %s2249_s13 = smov 8  }
   0xd   :  { %21 = dma.hbm_to_vmem [thread:$0]  %s2361_s0, 8192, %s16_s10, [#allocation3], %s2248_s12, %s2248_s12, %s2249_s13  }
   0xe   :  { %s2250_s16 = smov [#allocation5]  }
   0xf   :  { %s27_s17 = sshll.u32 %s2250_s16, 4  ;;  %s28_s17 = int_to_ptr.vmem [resolvable:$true] %s27_s17 }
  0x10   :  { %s2209_s18 = scalar_lea.vmem %s28_s17, 3072  ;;  %p2214_p6 = scmp.lt.s32.totalorder %s28_s17, %s28_s17 }
  0x11   :  { %p2210_p5 = scmp.ne.s32.totalorder %s28_s17, %s2209_s18  ;;  %p2215_p7 = scmp.lt.s32.totalorder %s2209_s18, %s2209_s18 }
  0x13   :  { %p2216_p8 = por %p2215_p7, %p2214_p6 }
  0x15   :  { %p2217_p9 = pnand %p2216_p8, %p2210_p5 }
  0x17   :  { %2220 = shalt.err (!%p2217_p9)
}
  0x18   :  { %s2251_s19 = smov 192   ;;  %s2252_s20 = smov 12  }
  0x19   :  { %33 = dma.hbm_to_vmem [thread:$0]  %s2362_s1, 3072, %s28_s17, [#allocation6], %s2251_s19, %s2251_s19, %s2252_s20  }
  0x1a   :  { %2241 = dma.done.wait [#allocation3], 8192  }
  0x1b   :  { %2242 = vsyncadd [#allocation3], 4294959104 }
  0x1c   :  { %2243 = dma.done.wait [#allocation6], 3072  }
  0x1d   :  { %2244 = vsyncadd [#allocation6], 4294964224  ;;  %v2253_v0 = vmov 0   ;;  %v2149_v1 = vld [vmem:[#allocation5 + $0xac] ss:$12 sps:$4 sm:$0xff]   ;;  %v41_v17 = vld [vmem:[#allocation2] sm:$0xff] }
  0x1e   :  { %329 = vmatprep.mubr.bf16.mxu0 %v2253_v0  ;;  %569 = vmatprep.mubr.bf16.mxu1 %v2253_v0  ;;  %v2151_v2 = vld [vmem:[#allocation5 + $0xa8] ss:$12 sps:$4 sm:$0xff]   ;;  %v2154_v4 = vld [vmem:[#allocation5 + $0x90] ss:$12 sps:$4 sm:$0xff]   ;;  %v2157_v6 = vld [vmem:[#allocation5 + $0x78] ss:$12 sps:$4 sm:$0xff]  }
  0x1f   :  { %297 = vmatprep.subr.bf16.mxu0 %v2149_v1  ;;  %2125 = vmatprep.subr.bf16.mxu1 %v2149_v1  ;;  %v2152_v3 = vld [vmem:[#allocation5 + $0x94] ss:$12 sps:$4 sm:$0xff]   ;;  %v2155_v5 = vld [vmem:[#allocation5 + $0x7c] ss:$12 sps:$4 sm:$0xff]   ;;  %v2158_v7 = vld [vmem:[#allocation5 + $0x64] ss:$12 sps:$4 sm:$0xff]  }
  0x20   :  { %298 = vmatpush1.bf16.msra.mxu0 %v2151_v2  ;;  %2133 = vmatpush1.bf16.msra.mxu1 %v2151_v2  ;;  %v2160_v8 = vld [vmem:[#allocation5 + $0x60] ss:$12 sps:$4 sm:$0xff]   ;;  %v2163_v10 = vld [vmem:[#allocation5 + $0x48] ss:$12 sps:$4 sm:$0xff]   ;;  %v2166_v12 = vld [vmem:[#allocation5 + $0x30] ss:$12 sps:$4 sm:$0xff]  }
  0x21   :  { %299 = vmatprep.subr.bf16.mxu0 %v2152_v3  ;;  %2126 = vmatprep.subr.bf16.mxu1 %v2152_v3  ;;  %v2161_v9 = vld [vmem:[#allocation5 + $0x4c] ss:$12 sps:$4 sm:$0xff]   ;;  %v2164_v11 = vld [vmem:[#allocation5 + $0x34] ss:$12 sps:$4 sm:$0xff]   ;;  %v2167_v13 = vld [vmem:[#allocation5 + $0x1c] ss:$12 sps:$4 sm:$0xff]  }
  0x22   :  { %v2169_v14 = vld [vmem:[#allocation5 + $0x18] ss:$12 sps:$4 sm:$0xff]   ;;  %v2172_v16 = vld [vmem:[#allocation5] ss:$12 sps:$4 sm:$0xff]   ;;  %v2173_v21 = vld [vmem:[#allocation5 + $0xb0] ss:$12 sps:$4 sm:$0xff]  }
  0x23   :  { %v2170_v15 = vld [vmem:[#allocation5 + $0x4] ss:$12 sps:$4 sm:$0xff]   ;;  %v42_v18 = vld [vmem:[#allocation2 + $0x8] sm:$0xff]  ;;  %v44_v26 = vld [vmem:[#allocation2 + $0x18] sm:$0xff]  ;;  %s2254_s0 = smov [#allocation7]  }
  0x24   :  { %300 = vmatpush1.bf16.msra.mxu0 %v2154_v4  ;;  %2134 = vmatpush1.bf16.msra.mxu1 %v2154_v4  ;;  %v89_v19 = vld [vmem:[#allocation2 + $0x180] sm:$0xff]  ;;  %v90_v20 = vld [vmem:[#allocation2 + $0x188] sm:$0xff]  ;;  %v2281_v22 = vpack.c.bf16 %v42_v18, %v41_v17  ;;  %v43_v25 = vld [vmem:[#allocation2 + $0x10] sm:$0xff]  ;;  %s1712_s1 = sshll.u32 %s2254_s0, 4  ;;  %s1713_s1 = int_to_ptr.vmem [resolvable:$true] %s1712_s1 }
  0x25   :  { %301 = vmatprep.subr.bf16.mxu0 %v2155_v5  ;;  %2127 = vmatprep.subr.bf16.mxu1 %v2155_v5  ;;  %v2283_v23 = vpack.c.bf16 %v90_v20, %v89_v19  ;;  %v2174_v24 = vld [vmem:[#allocation5 + $0x98] ss:$12 sps:$4 sm:$0xff]   ;;  %v91_v27 = vld [vmem:[#allocation2 + $0x190] sm:$0xff]  ;;  %v2175_v29 = vld [vmem:[#allocation5 + $0x80] ss:$12 sps:$4 sm:$0xff]   ;;  %v2289_v30 = vpack.c.bf16 %v44_v26, %v43_v25  ;;  %s2221_s23 = scalar_lea.vmem %s1713_s1, 12288  ;;  %p2226_p11 = scmp.lt.s32.totalorder %s1713_s1, %s1713_s1 }
  0x26   :  { %v92_v28 = vld [vmem:[#allocation2 + $0x198] sm:$0xff]  ;;  %v2176_v32 = vld [vmem:[#allocation5 + $0x68] ss:$12 sps:$4 sm:$0xff]   ;;  %v45_v33 = vld [vmem:[#allocation2 + $0x20] sm:$0xff]  ;;  %p2222_p10 = scmp.ne.s32.totalorder %s1713_s1, %s2221_s23  ;;  %p2227_p12 = scmp.lt.s32.totalorder %s2221_s23, %s2221_s23 }
  0x27   :  { %v2291_v31 = vpack.c.bf16 %v92_v28, %v91_v27  ;;  %v46_v34 = vld [vmem:[#allocation2 + $0x28] sm:$0xff]  ;;  %v93_v35 = vld [vmem:[#allocation2 + $0x1a0] sm:$0xff]  ;;  %v2177_v37 = vld [vmem:[#allocation5 + $0x50] ss:$12 sps:$4 sm:$0xff]  }
  0x28   :  { %302 = vmatpush1.bf16.msra.mxu0 %v2157_v6  ;;  %2135 = vmatpush1.bf16.msra.mxu1 %v2157_v6  ;;  %v94_v36 = vld [vmem:[#allocation2 + $0x1a8] sm:$0xff]  ;;  %v2297_v38 = vpack.c.bf16 %v46_v34, %v45_v33  ;;  %v2178_v40 = vld [vmem:[#allocation5 + $0x38] ss:$12 sps:$4 sm:$0xff]   ;;  %v47_v41 = vld [vmem:[#allocation2 + $0x30] sm:$0xff]  ;;  %p2228_p13 = por %p2227_p12, %p2226_p11 }
  0x29   :  { %303 = vmatprep.subr.bf16.mxu0 %v2158_v7  ;;  %2128 = vmatprep.subr.bf16.mxu1 %v2158_v7  ;;  %v2299_v39 = vpack.c.bf16 %v94_v36, %v93_v35  ;;  %v48_v42 = vld [vmem:[#allocation2 + $0x38] sm:$0xff]  ;;  %v95_v43 = vld [vmem:[#allocation2 + $0x1b0] sm:$0xff]  ;;  %v2179_v45 = vld [vmem:[#allocation5 + $0x20] ss:$12 sps:$4 sm:$0xff]  }
  0x2a   :  { %v96_v44 = vld [vmem:[#allocation2 + $0x1b8] sm:$0xff]  ;;  %v108_v46 = vpack.c.bf16 %v48_v42, %v47_v41  ;;  %v2180_v48 = vld [vmem:[#allocation5 + $0x8] ss:$12 sps:$4 sm:$0xff]   ;;  %v49_v49 = vld [vmem:[#allocation2 + $0x40] sm:$0xff]  ;;  %p2229_p0 = pnand %p2228_p13, %p2222_p10 }
  0x2b   :  { %v2305_v47 = vpack.c.bf16 %v96_v44, %v95_v43  ;;  %v50_v50 = vld [vmem:[#allocation2 + $0x48] sm:$0xff]  ;;  %v97_v51 = vld [vmem:[#allocation2 + $0x1c0] sm:$0xff]  ;;  %v51_v55 = vld [vmem:[#allocation2 + $0x50] sm:$0xff] }
  0x2c   :  { %304 = vmatpush1.bf16.msra.mxu0 %v2160_v8  ;;  %2136 = vmatpush1.bf16.msra.mxu1 %v2160_v8  ;;  %v98_v52 = vld [vmem:[#allocation2 + $0x1c8] sm:$0xff]  ;;  %v109_v53 = vpack.c.bf16 %v50_v50, %v49_v49  ;;  %v52_v56 = vld [vmem:[#allocation2 + $0x58] sm:$0xff]  ;;  %v99_v57 = vld [vmem:[#allocation2 + $0x1d0] sm:$0xff] }
  0x2d   :  { %305 = vmatprep.subr.bf16.mxu0 %v2161_v9  ;;  %2129 = vmatprep.subr.bf16.mxu1 %v2161_v9  ;;  %v2310_v54 = vpack.c.bf16 %v98_v52, %v97_v51  ;;  %v100_v58 = vld [vmem:[#allocation2 + $0x1d8] sm:$0xff]  ;;  %v110_v59 = vpack.c.bf16 %v52_v56, %v51_v55  ;;  %v53_v61 = vld [vmem:[#allocation2 + $0x60] sm:$0xff]  ;;  %v54_v62 = vld [vmem:[#allocation2 + $0x68] sm:$0xff] }
  0x2e   :  { %v2315_v60 = vpack.c.bf16 %v100_v58, %v99_v57  ;;  %v101_v63 = vld [vmem:[#allocation2 + $0x1e0] sm:$0xff]  ;;  %v102_v1 = vld [vmem:[#allocation2 + $0x1e8] sm:$0xff]  ;;  %v111_v2 = vpack.c.bf16 %v54_v62, %v53_v61  ;;  %v55_v4 = vld [vmem:[#allocation2 + $0x70] sm:$0xff] }
  0x2f   :  { %v2320_v3 = vpack.c.bf16 %v102_v1, %v101_v63  ;;  %v56_v5 = vld [vmem:[#allocation2 + $0x78] sm:$0xff]  ;;  %v103_v6 = vld [vmem:[#allocation2 + $0x1f0] sm:$0xff]  ;;  %v62_v17 = vld [vmem:[#allocation2 + $0xa8] sm:$0xff] }
  0x30   :  { %306 = vmatpush1.bf16.msra.mxu0 %v2163_v10  ;;  %2137 = vmatpush1.bf16.msra.mxu1 %v2163_v10  ;;  %v104_v7 = vld [vmem:[#allocation2 + $0x1f8] sm:$0xff]  ;;  %v112_v8 = vpack.c.bf16 %v56_v5, %v55_v4  ;;  %v57_v10 = vld [vmem:[#allocation2 + $0x80] sm:$0xff]  ;;  %v63_v19 = vld [vmem:[#allocation2 + $0xb0] sm:$0xff] }
  0x31   :  { %307 = vmatprep.subr.bf16.mxu0 %v2164_v11  ;;  %2130 = vmatprep.subr.bf16.mxu1 %v2164_v11  ;;  %v2325_v9 = vpack.c.bf16 %v104_v7, %v103_v6  ;;  %v58_v11 = vld [vmem:[#allocation2 + $0x88] sm:$0xff]  ;;  %v64_v20 = vld [vmem:[#allocation2 + $0xb8] sm:$0xff]  ;;  %v67_v26 = vld [vmem:[#allocation2 + $0xd0] sm:$0xff] }
  0x32   :  { %v68_v27 = vld [vmem:[#allocation2 + $0xd8] sm:$0xff]  ;;  %v71_v33 = vld [vmem:[#allocation2 + $0xf0] sm:$0xff]  ;;  %v73_v35 = vld [vmem:[#allocation2 + $0x100] sm:$0xff] }
  0x33   :  { %v118_v28 = vpack.c.bf16 %v68_v27, %v67_v26  ;;  %v72_v34 = vld [vmem:[#allocation2 + $0xf8] sm:$0xff]  ;;  %v74_v36 = vld [vmem:[#allocation2 + $0x108] sm:$0xff]  ;;  %v77_v42 = vld [vmem:[#allocation2 + $0x120] sm:$0xff] }
  0x34   :  { %308 = vmatpush1.bf16.msra.mxu0 %v2166_v12  ;;  %2138 = vmatpush1.bf16.msra.mxu1 %v2166_v12  ;;  %v113_v12 = vpack.c.bf16 %v58_v11, %v57_v10  ;;  %v76_v41 = vld [vmem:[#allocation2 + $0x118] sm:$0xff]  ;;  %v78_v43 = vld [vmem:[#allocation2 + $0x128] sm:$0xff]  ;;  %v81_v49 = vld [vmem:[#allocation2 + $0x140] sm:$0xff] }
  0x35   :  { %309 = vmatprep.subr.bf16.mxu0 %v2167_v13  ;;  %2131 = vmatprep.subr.bf16.mxu1 %v2167_v13  ;;  %v59_v13 = vld [vmem:[#allocation2 + $0x90] sm:$0xff]  ;;  %v82_v50 = vld [vmem:[#allocation2 + $0x148] sm:$0xff]  ;;  %v84_v55 = vld [vmem:[#allocation2 + $0x158] sm:$0xff] }
  0x36   :  { %v125_v52 = vpack.c.bf16 %v82_v50, %v81_v49  ;;  %v85_v56 = vld [vmem:[#allocation2 + $0x160] sm:$0xff]  ;;  %v86_v57 = vld [vmem:[#allocation2 + $0x168] sm:$0xff]  ;;  %v87_v61 = vld [vmem:[#allocation2 + $0x170] sm:$0xff] }
  0x37   :  { %v88_v62 = vld [vmem:[#allocation2 + $0x178] sm:$0xff] }
  0x38   :  { %310 = vmatpush1.bf16.msra.mxu0 %v2169_v14  ;;  %2139 = vmatpush1.bf16.msra.mxu1 %v2169_v14  ;;  %v60_v14 = vld [vmem:[#allocation2 + $0x98] sm:$0xff]  ;;  %v128_v63 = vpack.c.bf16 %v88_v62, %v87_v61 }
  0x39   :  { %311 = vmatprep.subr.bf16.mxu0 %v2170_v15  ;;  %2132 = vmatprep.subr.bf16.mxu1 %v2170_v15  ;;  %v114_v15 = vpack.c.bf16 %v60_v14, %v59_v13 }
  0x3c   :  { %312 = vmatpush1.bf16.msra.mxu0 %v2172_v16  ;;  %2140 = vmatpush1.bf16.msra.mxu1 %v2172_v16  ;;  %v61_v16 = vld [vmem:[#allocation2 + $0xa0] sm:$0xff] }
  0x3d   :  { %2045 = vmatprep.subr.bf16.mxu1 %v2173_v21  ;;  %v115_v18 = vpack.c.bf16 %v62_v17, %v61_v16 }
  0x3f   :  { %330 = vmatmul.mubr.bf16.vlgmr.msra.gmra.mxu0 %v2281_v22  ;;  %570 = vmatmul.mubr.bf16.vlgmr.msra.gmra.mxu1 %v2283_v23 }
  0x40   :  { %2046 = vmatpush3.bf16.msra.mxu1 %v2173_v21  ;;  %339 = vmatprep.mubr.bf16.mxu0 %v2253_v0  ;;  %v116_v21 = vpack.c.bf16 %v64_v20, %v63_v19 }
  0x41   :  { %579 = vmatprep.mubr.bf16.mxu1 %v2253_v0  ;;  %2047 = vmatprep.subr.bf16.mxu1 %v2174_v24 }
  0x44   :  { %2048 = vmatpush3.bf16.msra.mxu1 %v2174_v24  ;;  %v66_v24 = vld [vmem:[#allocation2 + $0xc8] sm:$0xff] }
  0x45   :  { %2049 = vmatprep.subr.bf16.mxu1 %v2175_v29 }
  0x47   :  { %340 = vmatmul.mubr.bf16.gmra.mxu0 %v2289_v30  ;;  %580 = vmatmul.mubr.bf16.gmra.mxu1 %v2291_v31 }
  0x48   :  { %349 = vmatprep.mubr.bf16.mxu0 %v2253_v0  ;;  %589 = vmatprep.mubr.bf16.mxu1 %v2253_v0 }
  0x49   :  { %2050 = vmatpush3.bf16.msra.mxu1 %v2175_v29  ;;  %v69_v29 = vld [vmem:[#allocation2 + $0xe0] sm:$0xff] }
  0x4a   :  { %2051 = vmatprep.subr.bf16.mxu1 %v2176_v32 }
  0x4d   :  { %2052 = vmatpush3.bf16.msra.mxu1 %v2176_v32 }
  0x4e   :  { %2053 = vmatprep.subr.bf16.mxu1 %v2177_v37 }
  0x4f   :  { %350 = vmatmul.mubr.bf16.gmra.mxu0 %v2297_v38  ;;  %590 = vmatmul.mubr.bf16.gmra.mxu1 %v2299_v39 }
  0x50   :  { %359 = vmatprep.mubr.bf16.mxu0 %v2253_v0  ;;  %599 = vmatprep.mubr.bf16.mxu1 %v2253_v0 }
  0x51   :  { %2054 = vmatpush3.bf16.msra.mxu1 %v2177_v37  ;;  %v120_v37 = vpack.c.bf16 %v72_v34, %v71_v33 }
  0x52   :  { %2055 = vmatprep.subr.bf16.mxu1 %v2178_v40 }
  0x55   :  { %2056 = vmatpush3.bf16.msra.mxu1 %v2178_v40  ;;  %v75_v40 = vld [vmem:[#allocation2 + $0x110] sm:$0xff] }
  0x56   :  { %2057 = vmatprep.subr.bf16.mxu1 %v2179_v45  ;;  %v122_v44 = vpack.c.bf16 %v76_v41, %v75_v40 }
  0x57   :  { %360 = vmatmul.mubr.bf16.gmra.mxu0 %v108_v46  ;;  %600 = vmatmul.mubr.bf16.gmra.mxu1 %v2305_v47 }
  0x58   :  { %369 = vmatprep.mubr.bf16.mxu0 %v2253_v0  ;;  %609 = vmatprep.mubr.bf16.mxu1 %v2253_v0 }
  0x59   :  { %2058 = vmatpush3.bf16.msra.mxu1 %v2179_v45  ;;  %v123_v45 = vpack.c.bf16 %v78_v43, %v77_v42 }
  0x5a   :  { %2059 = vmatprep.subr.bf16.mxu1 %v2180_v48 }
  0x5d   :  { %2060 = vmatpush3.bf16.msra.mxu1 %v2180_v48  ;;  %v80_v48 = vld [vmem:[#allocation2 + $0x138] sm:$0xff] }
  0x5f   :  { %370 = vmatmul.mubr.bf16.gmra.mxu0 %v109_v53  ;;  %610 = vmatmul.mubr.bf16.gmra.mxu1 %v2310_v54 }
  0x60   :  { %379 = vmatprep.mubr.bf16.mxu0 %v2253_v0  ;;  %619 = vmatprep.mubr.bf16.mxu1 %v2253_v0 }
  0x67   :  { %380 = vmatmul.mubr.bf16.gmra.mxu0 %v110_v59  ;;  %620 = vmatmul.mubr.bf16.gmra.mxu1 %v2315_v60 }
  0x68   :  { %389 = vmatprep.mubr.bf16.mxu0 %v2253_v0  ;;  %629 = vmatprep.mubr.bf16.mxu1 %v2253_v0 }
  0x6f   :  { %390 = vmatmul.mubr.bf16.gmra.mxu0 %v111_v2  ;;  %630 = vmatmul.mubr.bf16.gmra.mxu1 %v2320_v3 }
  0x70   :  { %399 = vmatprep.mubr.bf16.mxu0 %v2253_v0  ;;  %639 = vmatprep.mubr.bf16.mxu1 %v2253_v0 }
  0x77   :  { %400 = vmatmul.mubr.bf16.gmra.mxu0 %v112_v8  ;;  %640 = vmatmul.mubr.bf16.gmra.mxu1 %v2325_v9 }
  0x78   :  { %409 = vmatprep.mubr.bf16.mxu0 %v2253_v0  ;;  %2061 = vmatprep.mubr.bf16.mxu1 %v2281_v22  ;;  %v65_v22 = vld [vmem:[#allocation2 + $0xc0] sm:$0xff] }
  0x79   :  { %v117_v25 = vpack.c.bf16 %v66_v24, %v65_v22 }
  0x7f   :  { %410 = vmatmul.mubr.bf16.gmra.mxu0 %v113_v12  ;;  %2062 = vmatmul.mubr.bf16.vlgmr.msra.gmra.mxu1 %v2289_v30  ;;  %v70_v30 = vld [vmem:[#allocation2 + $0xe8] sm:$0xff] }
  0x80   :  { %419 = vmatprep.mubr.bf16.mxu0 %v2253_v0  ;;  %2065 = vmatprep.mubr.bf16.mxu1 %v2297_v38  ;;  %v119_v32 = vpack.c.bf16 %v70_v30, %v69_v29  ;;  %v121_v38 = vpack.c.bf16 %v74_v36, %v73_v35 }
  0x87   :  { %420 = vmatmul.mubr.bf16.gmra.mxu0 %v114_v15  ;;  %2066 = vmatmul.mubr.bf16.gmra.mxu1 %v108_v46  ;;  %v79_v46 = vld [vmem:[#allocation2 + $0x130] sm:$0xff] }
  0x88   :  { %429 = vmatprep.mubr.bf16.mxu0 %v2253_v0  ;;  %2069 = vmatprep.mubr.bf16.mxu1 %v109_v53  ;;  %v124_v51 = vpack.c.bf16 %v80_v48, %v79_v46  ;;  %v83_v53 = vld [vmem:[#allocation2 + $0x150] sm:$0xff] }
  0x89   :  { %v126_v58 = vpack.c.bf16 %v84_v55, %v83_v53 }
  0x8f   :  { %430 = vmatmul.mubr.bf16.gmra.mxu0 %v115_v18  ;;  %2070 = vmatmul.mubr.bf16.gmra.mxu1 %v110_v59  ;;  %v127_v59 = vpack.c.bf16 %v86_v57, %v85_v56 }
  0x90   :  { %439 = vmatprep.mubr.bf16.mxu0 %v2253_v0  ;;  %2073 = vmatprep.mubr.bf16.mxu1 %v111_v2 }
  0x97   :  { %440 = vmatmul.mubr.bf16.gmra.mxu0 %v116_v21  ;;  %2074 = vmatmul.mubr.bf16.gmra.mxu1 %v112_v8 }
  0x98   :  { %449 = vmatprep.mubr.bf16.mxu0 %v2253_v0  ;;  %2077 = vmatprep.mubr.bf16.mxu1 %v113_v12 }
  0x9f   :  { %450 = vmatmul.mubr.bf16.gmra.mxu0 %v117_v25  ;;  %2078 = vmatmul.mubr.bf16.gmra.mxu1 %v114_v15 }
  0xa0   :  { %459 = vmatprep.mubr.bf16.mxu0 %v2253_v0  ;;  %2081 = vmatprep.mubr.bf16.mxu1 %v115_v18 }
  0xa7   :  { %460 = vmatmul.mubr.bf16.gmra.mxu0 %v118_v28  ;;  %2082 = vmatmul.mubr.bf16.gmra.mxu1 %v116_v21 }
  0xa8   :  { %469 = vmatprep.mubr.bf16.mxu0 %v2253_v0  ;;  %2085 = vmatprep.mubr.bf16.mxu1 %v117_v25 }
  0xaf   :  { %470 = vmatmul.mubr.bf16.gmra.mxu0 %v119_v32  ;;  %2086 = vmatmul.mubr.bf16.gmra.mxu1 %v118_v28 }
  0xb0   :  { %479 = vmatprep.mubr.bf16.mxu0 %v2253_v0  ;;  %2089 = vmatprep.mubr.bf16.mxu1 %v119_v32 }
  0xb7   :  { %480 = vmatmul.mubr.bf16.gmra.mxu0 %v120_v37  ;;  %2090 = vmatmul.mubr.bf16.gmra.mxu1 %v120_v37 }
  0xb8   :  { %489 = vmatprep.mubr.bf16.mxu0 %v2253_v0  ;;  %2093 = vmatprep.mubr.bf16.mxu1 %v121_v38 }
  0xbf   :  { %490 = vmatmul.mubr.bf16.gmra.mxu0 %v121_v38  ;;  %2094 = vmatmul.mubr.bf16.gmra.mxu1 %v122_v44 }
  0xc0   :  { %499 = vmatprep.mubr.bf16.mxu0 %v2253_v0  ;;  %2097 = vmatprep.mubr.bf16.mxu1 %v123_v45 }
  0xc7   :  { %500 = vmatmul.mubr.bf16.gmra.mxu0 %v122_v44  ;;  %2098 = vmatmul.mubr.bf16.gmra.mxu1 %v124_v51 }
  0xc8   :  { %509 = vmatprep.mubr.bf16.mxu0 %v2253_v0  ;;  %2101 = vmatprep.mubr.bf16.mxu1 %v125_v52 }
  0xcf   :  { %510 = vmatmul.mubr.bf16.gmra.mxu0 %v123_v45  ;;  %2102 = vmatmul.mubr.bf16.gmra.mxu1 %v126_v58 }
  0xd0   :  { %519 = vmatprep.mubr.bf16.mxu0 %v2253_v0  ;;  %2105 = vmatprep.mubr.bf16.mxu1 %v127_v59 }
  0xd7   :  { %520 = vmatmul.mubr.bf16.gmra.mxu0 %v124_v51  ;;  %2106 = vmatmul.mubr.bf16.gmra.mxu1 %v128_v63 }
  0xd8   :  { %529 = vmatprep.mubr.bf16.mxu0 %v2253_v0  ;;  %2109 = vmatprep.mubr.bf16.mxu1 %v2283_v23 }
  0xdf   :  { %530 = vmatmul.mubr.bf16.gmra.mxu0 %v125_v52  ;;  %2110 = vmatmul.mubr.bf16.gmra.mxu1 %v2291_v31 }
  0xe0   :  { %539 = vmatprep.mubr.bf16.mxu0 %v2253_v0  ;;  %2113 = vmatprep.mubr.bf16.mxu1 %v2299_v39 }
  0xe7   :  { %540 = vmatmul.mubr.bf16.gmra.mxu0 %v126_v58  ;;  %2114 = vmatmul.mubr.bf16.gmra.mxu1 %v2305_v47 }
  0xe8   :  { %549 = vmatprep.mubr.bf16.mxu0 %v2253_v0  ;;  %2117 = vmatprep.mubr.bf16.mxu1 %v2310_v54 }
  0xef   :  { %550 = vmatmul.mubr.bf16.gmra.mxu0 %v127_v59  ;;  %2118 = vmatmul.mubr.bf16.gmra.mxu1 %v2315_v60 }
  0xf0   :  { %559 = vmatprep.mubr.bf16.mxu0 %v2253_v0  ;;  %2121 = vmatprep.mubr.bf16.mxu1 %v2320_v3 }
  0xf7   :  { %560 = vmatmul.mubr.bf16.gmra.mxu0 %v128_v63  ;;  %2122 = vmatmul.mubr.bf16.gmra.mxu1 %v2325_v9 }
  0xff   :  { %v331_v23 = vpop.f32.mrf.mxu0  ;;  %v571_v31 = vpop.f32.mrf.mxu1 }
 0x101   :  { %v333_v39 = vpop.f32.mrf.mxu0  ;;  %v573_v1 = vpop.f32.mrf.mxu1 }
 0x102   :  { %v1877_v2 = vpack.c.bf16 %v333_v39, %v331_v23  ;;  %v1973_v47 = vpack.c.bf16 %v573_v1, %v571_v31 }
 0x103   :  { %v335_v4 = vpop.f32.mrf.mxu0  ;;  %v575_v5 = vpop.f32.mrf.mxu1 }
 0x104   :  { %1579 = vst [vmem:[#allocation7] sm:$0xff] %v1877_v2  ;;  %1675 = vst [vmem:[#allocation7 + $0x240] sm:$0xff] %v1973_v47 }
 0x105   :  { %v337_v54 = vpop.f32.mrf.mxu0  ;;  %v577_v6 = vpop.f32.mrf.mxu1 }
 0x106   :  { %v1879_v60 = vpack.c.bf16 %v337_v54, %v335_v4  ;;  %v1975_v7 = vpack.c.bf16 %v577_v6, %v575_v5 }
 0x107   :  { %v341_v0 = vpop.f32.mrf.mxu0  ;;  %v581_v8 = vpop.f32.mrf.mxu1 }
 0x108   :  { %1581 = vst [vmem:[#allocation7 + $0xc] sm:$0xff] %v1879_v60  ;;  %1677 = vst [vmem:[#allocation7 + $0x24c] sm:$0xff] %v1975_v7 }
 0x109   :  { %v343_v3 = vpop.f32.mrf.mxu0  ;;  %v583_v9 = vpop.f32.mrf.mxu1 }
 0x10a   :  { %v1881_v10 = vpack.c.bf16 %v343_v3, %v341_v0  ;;  %v1977_v11 = vpack.c.bf16 %v583_v9, %v581_v8 }
 0x10b   :  { %v345_v12 = vpop.f32.mrf.mxu0  ;;  %v585_v13 = vpop.f32.mrf.mxu1 }
 0x10c   :  { %1583 = vst [vmem:[#allocation7 + $0x18] sm:$0xff] %v1881_v10  ;;  %1679 = vst [vmem:[#allocation7 + $0x258] sm:$0xff] %v1977_v11 }
 0x10d   :  { %v347_v14 = vpop.f32.mrf.mxu0  ;;  %v587_v15 = vpop.f32.mrf.mxu1 }
 0x10e   :  { %v1883_v16 = vpack.c.bf16 %v347_v14, %v345_v12  ;;  %v1979_v17 = vpack.c.bf16 %v587_v15, %v585_v13 }
 0x10f   :  { %v351_v18 = vpop.f32.mrf.mxu0  ;;  %v591_v19 = vpop.f32.mrf.mxu1 }
 0x110   :  { %1585 = vst [vmem:[#allocation7 + $0x24] sm:$0xff] %v1883_v16  ;;  %1681 = vst [vmem:[#allocation7 + $0x264] sm:$0xff] %v1979_v17 }
 0x111   :  { %v353_v20 = vpop.f32.mrf.mxu0  ;;  %v593_v21 = vpop.f32.mrf.mxu1 }
 0x112   :  { %v1885_v22 = vpack.c.bf16 %v353_v20, %v351_v18  ;;  %v1981_v24 = vpack.c.bf16 %v593_v21, %v591_v19 }
 0x113   :  { %v355_v25 = vpop.f32.mrf.mxu0  ;;  %v595_v26 = vpop.f32.mrf.mxu1 }
 0x114   :  { %1587 = vst [vmem:[#allocation7 + $0x30] sm:$0xff] %v1885_v22  ;;  %1683 = vst [vmem:[#allocation7 + $0x270] sm:$0xff] %v1981_v24 }
 0x115   :  { %v357_v27 = vpop.f32.mrf.mxu0  ;;  %v597_v28 = vpop.f32.mrf.mxu1 }
 0x116   :  { %v1887_v29 = vpack.c.bf16 %v357_v27, %v355_v25  ;;  %v1983_v30 = vpack.c.bf16 %v597_v28, %v595_v26 }
 0x117   :  { %v361_v32 = vpop.f32.mrf.mxu0  ;;  %v601_v33 = vpop.f32.mrf.mxu1 }
 0x118   :  { %1589 = vst [vmem:[#allocation7 + $0x3c] sm:$0xff] %v1887_v29  ;;  %1685 = vst [vmem:[#allocation7 + $0x27c] sm:$0xff] %v1983_v30 }
 0x119   :  { %v363_v34 = vpop.f32.mrf.mxu0  ;;  %v603_v35 = vpop.f32.mrf.mxu1 }
 0x11a   :  { %v1889_v36 = vpack.c.bf16 %v363_v34, %v361_v32  ;;  %v1985_v37 = vpack.c.bf16 %v603_v35, %v601_v33 }
 0x11b   :  { %v365_v38 = vpop.f32.mrf.mxu0  ;;  %v605_v40 = vpop.f32.mrf.mxu1 }
 0x11c   :  { %1591 = vst [vmem:[#allocation7 + $0x48] sm:$0xff] %v1889_v36  ;;  %1687 = vst [vmem:[#allocation7 + $0x288] sm:$0xff] %v1985_v37 }
 0x11d   :  { %v367_v41 = vpop.f32.mrf.mxu0  ;;  %v607_v42 = vpop.f32.mrf.mxu1 }
 0x11e   :  { %v1891_v43 = vpack.c.bf16 %v367_v41, %v365_v38  ;;  %v1987_v44 = vpack.c.bf16 %v607_v42, %v605_v40 }
 0x11f   :  { %v371_v45 = vpop.f32.mrf.mxu0  ;;  %v611_v46 = vpop.f32.mrf.mxu1 }
 0x120   :  { %1593 = vst [vmem:[#allocation7 + $0x54] sm:$0xff] %v1891_v43  ;;  %1689 = vst [vmem:[#allocation7 + $0x294] sm:$0xff] %v1987_v44 }
 0x121   :  { %v373_v48 = vpop.f32.mrf.mxu0  ;;  %v613_v49 = vpop.f32.mrf.mxu1 }
 0x122   :  { %v1893_v50 = vpack.c.bf16 %v373_v48, %v371_v45  ;;  %v1989_v51 = vpack.c.bf16 %v613_v49, %v611_v46 }
 0x123   :  { %v375_v52 = vpop.f32.mrf.mxu0  ;;  %v615_v53 = vpop.f32.mrf.mxu1 }
 0x124   :  { %1595 = vst [vmem:[#allocation7 + $0x60] sm:$0xff] %v1893_v50  ;;  %1691 = vst [vmem:[#allocation7 + $0x2a0] sm:$0xff] %v1989_v51 }
 0x125   :  { %v377_v55 = vpop.f32.mrf.mxu0  ;;  %v617_v56 = vpop.f32.mrf.mxu1 }
 0x126   :  { %v1895_v57 = vpack.c.bf16 %v377_v55, %v375_v52  ;;  %v1991_v58 = vpack.c.bf16 %v617_v56, %v615_v53 }
 0x127   :  { %v381_v59 = vpop.f32.mrf.mxu0  ;;  %v621_v61 = vpop.f32.mrf.mxu1 }
 0x128   :  { %1597 = vst [vmem:[#allocation7 + $0x6c] sm:$0xff] %v1895_v57  ;;  %1693 = vst [vmem:[#allocation7 + $0x2ac] sm:$0xff] %v1991_v58 }
 0x129   :  { %v383_v62 = vpop.f32.mrf.mxu0  ;;  %v623_v63 = vpop.f32.mrf.mxu1 }
 0x12a   :  { %v1897_v23 = vpack.c.bf16 %v383_v62, %v381_v59  ;;  %v1993_v31 = vpack.c.bf16 %v623_v63, %v621_v61 }
 0x12b   :  { %v385_v39 = vpop.f32.mrf.mxu0  ;;  %v625_v1 = vpop.f32.mrf.mxu1 }
 0x12c   :  { %1599 = vst [vmem:[#allocation7 + $0x78] sm:$0xff] %v1897_v23  ;;  %1695 = vst [vmem:[#allocation7 + $0x2b8] sm:$0xff] %v1993_v31 }
 0x12d   :  { %v387_v2 = vpop.f32.mrf.mxu0  ;;  %v627_v47 = vpop.f32.mrf.mxu1 }
 0x12e   :  { %v1899_v4 = vpack.c.bf16 %v387_v2, %v385_v39  ;;  %v1995_v5 = vpack.c.bf16 %v627_v47, %v625_v1 }
 0x12f   :  { %v391_v54 = vpop.f32.mrf.mxu0  ;;  %v631_v6 = vpop.f32.mrf.mxu1 }
 0x130   :  { %1601 = vst [vmem:[#allocation7 + $0x84] sm:$0xff] %v1899_v4  ;;  %1697 = vst [vmem:[#allocation7 + $0x2c4] sm:$0xff] %v1995_v5 }
 0x131   :  { %v393_v60 = vpop.f32.mrf.mxu0  ;;  %v633_v7 = vpop.f32.mrf.mxu1 }
 0x132   :  { %v1901_v0 = vpack.c.bf16 %v393_v60, %v391_v54  ;;  %v1997_v8 = vpack.c.bf16 %v633_v7, %v631_v6 }
 0x133   :  { %v395_v3 = vpop.f32.mrf.mxu0  ;;  %v635_v9 = vpop.f32.mrf.mxu1 }
 0x134   :  { %1603 = vst [vmem:[#allocation7 + $0x90] sm:$0xff] %v1901_v0  ;;  %1699 = vst [vmem:[#allocation7 + $0x2d0] sm:$0xff] %v1997_v8 }
 0x135   :  { %v397_v10 = vpop.f32.mrf.mxu0  ;;  %v637_v11 = vpop.f32.mrf.mxu1 }
 0x136   :  { %v1903_v12 = vpack.c.bf16 %v397_v10, %v395_v3  ;;  %v1999_v13 = vpack.c.bf16 %v637_v11, %v635_v9 }
 0x137   :  { %v401_v14 = vpop.f32.mrf.mxu0  ;;  %v641_v15 = vpop.f32.mrf.mxu1 }
 0x138   :  { %1605 = vst [vmem:[#allocation7 + $0x9c] sm:$0xff] %v1903_v12  ;;  %1701 = vst [vmem:[#allocation7 + $0x2dc] sm:$0xff] %v1999_v13 }
 0x139   :  { %v403_v16 = vpop.f32.mrf.mxu0  ;;  %v643_v17 = vpop.f32.mrf.mxu1 }
 0x13a   :  { %v1905_v18 = vpack.c.bf16 %v403_v16, %v401_v14  ;;  %v2001_v19 = vpack.c.bf16 %v643_v17, %v641_v15 }
 0x13b   :  { %v405_v20 = vpop.f32.mrf.mxu0  ;;  %v645_v21 = vpop.f32.mrf.mxu1 }
 0x13c   :  { %1607 = vst [vmem:[#allocation7 + $0xa8] sm:$0xff] %v1905_v18  ;;  %1703 = vst [vmem:[#allocation7 + $0x2e8] sm:$0xff] %v2001_v19 }
 0x13d   :  { %v407_v22 = vpop.f32.mrf.mxu0  ;;  %v647_v24 = vpop.f32.mrf.mxu1 }
 0x13e   :  { %v1907_v25 = vpack.c.bf16 %v407_v22, %v405_v20  ;;  %v2003_v26 = vpack.c.bf16 %v647_v24, %v645_v21 }
 0x13f   :  { %v411_v27 = vpop.f32.mrf.mxu0  ;;  %v2063_v28 = vpop.f32.mrf.mxu1 }
 0x140   :  { %1609 = vst [vmem:[#allocation7 + $0xb4] sm:$0xff] %v1907_v25  ;;  %1705 = vst [vmem:[#allocation7 + $0x2f4] sm:$0xff] %v2003_v26  ;;  %v1882_v29 = vpack.c.bf16 %v2063_v28, %v2063_v28 }
 0x141   :  { %v413_v30 = vpop.f32.mrf.mxu0  ;;  %v684_v32 = vpop.f32.mrf.mxu1 }
 0x142   :  { %1584 = vst [vmem:[#allocation7 + $0x20] sm:$0xf] %v1882_v29  ;;  %v1909_v33 = vpack.c.bf16 %v413_v30, %v411_v27  ;;  %v1878_v34 = vpack.c.bf16 %v684_v32, %v684_v32 }
 0x143   :  { %v415_v35 = vpop.f32.mrf.mxu0  ;;  %v2064_v36 = vpop.f32.mrf.mxu1 }
 0x144   :  { %1611 = vst [vmem:[#allocation7 + $0xc0] sm:$0xff] %v1909_v33  ;;  %1580 = vst [vmem:[#allocation7 + $0x8] sm:$0xf] %v1878_v34  ;;  %v1884_v37 = vpack.c.bf16 %v2064_v36, %v2064_v36 }
 0x145   :  { %v417_v38 = vpop.f32.mrf.mxu0  ;;  %v687_v40 = vpop.f32.mrf.mxu1 }
 0x146   :  { %1586 = vst [vmem:[#allocation7 + $0x2c] sm:$0xf] %v1884_v37  ;;  %v1911_v41 = vpack.c.bf16 %v417_v38, %v415_v35  ;;  %v1880_v42 = vpack.c.bf16 %v687_v40, %v687_v40 }
 0x147   :  { %v421_v43 = vpop.f32.mrf.mxu0  ;;  %v2067_v44 = vpop.f32.mrf.mxu1 }
 0x148   :  { %1613 = vst [vmem:[#allocation7 + $0xcc] sm:$0xff] %v1911_v41  ;;  %1582 = vst [vmem:[#allocation7 + $0x14] sm:$0xf] %v1880_v42  ;;  %v1890_v45 = vpack.c.bf16 %v2067_v44, %v2067_v44 }
 0x149   :  { %v423_v46 = vpop.f32.mrf.mxu0  ;;  %v700_v48 = vpop.f32.mrf.mxu1 }
 0x14a   :  { %1592 = vst [vmem:[#allocation7 + $0x50] sm:$0xf] %v1890_v45  ;;  %v1913_v49 = vpack.c.bf16 %v423_v46, %v421_v43  ;;  %v1886_v50 = vpack.c.bf16 %v700_v48, %v700_v48 }
 0x14b   :  { %v425_v51 = vpop.f32.mrf.mxu0  ;;  %v2068_v52 = vpop.f32.mrf.mxu1 }
 0x14c   :  { %1615 = vst [vmem:[#allocation7 + $0xd8] sm:$0xff] %v1913_v49  ;;  %1588 = vst [vmem:[#allocation7 + $0x38] sm:$0xf] %v1886_v50  ;;  %v1892_v53 = vpack.c.bf16 %v2068_v52, %v2068_v52 }
 0x14d   :  { %v427_v55 = vpop.f32.mrf.mxu0  ;;  %v703_v56 = vpop.f32.mrf.mxu1 }
 0x14e   :  { %1594 = vst [vmem:[#allocation7 + $0x5c] sm:$0xf] %v1892_v53  ;;  %v1915_v57 = vpack.c.bf16 %v427_v55, %v425_v51  ;;  %v1888_v58 = vpack.c.bf16 %v703_v56, %v703_v56 }
 0x14f   :  { %v431_v59 = vpop.f32.mrf.mxu0  ;;  %v2071_v61 = vpop.f32.mrf.mxu1 }
 0x150   :  { %1617 = vst [vmem:[#allocation7 + $0xe4] sm:$0xff] %v1915_v57  ;;  %1590 = vst [vmem:[#allocation7 + $0x44] sm:$0xf] %v1888_v58  ;;  %v1898_v62 = vpack.c.bf16 %v2071_v61, %v2071_v61 }
 0x151   :  { %v433_v63 = vpop.f32.mrf.mxu0  ;;  %v716_v23 = vpop.f32.mrf.mxu1 }
 0x152   :  { %1600 = vst [vmem:[#allocation7 + $0x80] sm:$0xf] %v1898_v62  ;;  %v1917_v31 = vpack.c.bf16 %v433_v63, %v431_v59  ;;  %v1894_v39 = vpack.c.bf16 %v716_v23, %v716_v23 }
 0x153   :  { %v435_v1 = vpop.f32.mrf.mxu0  ;;  %v2072_v2 = vpop.f32.mrf.mxu1 }
 0x154   :  { %1619 = vst [vmem:[#allocation7 + $0xf0] sm:$0xff] %v1917_v31  ;;  %1596 = vst [vmem:[#allocation7 + $0x68] sm:$0xf] %v1894_v39  ;;  %v1900_v47 = vpack.c.bf16 %v2072_v2, %v2072_v2 }
 0x155   :  { %v437_v4 = vpop.f32.mrf.mxu0  ;;  %v719_v5 = vpop.f32.mrf.mxu1 }
 0x156   :  { %1602 = vst [vmem:[#allocation7 + $0x8c] sm:$0xf] %v1900_v47  ;;  %v1919_v54 = vpack.c.bf16 %v437_v4, %v435_v1  ;;  %v1896_v6 = vpack.c.bf16 %v719_v5, %v719_v5 }
 0x157   :  { %v441_v60 = vpop.f32.mrf.mxu0  ;;  %v2075_v7 = vpop.f32.mrf.mxu1 }
 0x158   :  { %1621 = vst [vmem:[#allocation7 + $0xfc] sm:$0xff] %v1919_v54  ;;  %1598 = vst [vmem:[#allocation7 + $0x74] sm:$0xf] %v1896_v6  ;;  %v1906_v0 = vpack.c.bf16 %v2075_v7, %v2075_v7 }
 0x159   :  { %v443_v8 = vpop.f32.mrf.mxu0  ;;  %v732_v3 = vpop.f32.mrf.mxu1 }
 0x15a   :  { %1608 = vst [vmem:[#allocation7 + $0xb0] sm:$0xf] %v1906_v0  ;;  %v1921_v9 = vpack.c.bf16 %v443_v8, %v441_v60  ;;  %v1902_v10 = vpack.c.bf16 %v732_v3, %v732_v3 }
 0x15b   :  { %v445_v11 = vpop.f32.mrf.mxu0  ;;  %v2076_v12 = vpop.f32.mrf.mxu1 }
 0x15c   :  { %1623 = vst [vmem:[#allocation7 + $0x108] sm:$0xff] %v1921_v9  ;;  %1604 = vst [vmem:[#allocation7 + $0x98] sm:$0xf] %v1902_v10  ;;  %v1908_v13 = vpack.c.bf16 %v2076_v12, %v2076_v12 }
 0x15d   :  { %v447_v14 = vpop.f32.mrf.mxu0  ;;  %v735_v15 = vpop.f32.mrf.mxu1 }
 0x15e   :  { %1610 = vst [vmem:[#allocation7 + $0xbc] sm:$0xf] %v1908_v13  ;;  %v1923_v16 = vpack.c.bf16 %v447_v14, %v445_v11  ;;  %v1904_v17 = vpack.c.bf16 %v735_v15, %v735_v15 }
 0x15f   :  { %v451_v18 = vpop.f32.mrf.mxu0  ;;  %v2079_v19 = vpop.f32.mrf.mxu1 }
 0x160   :  { %1625 = vst [vmem:[#allocation7 + $0x114] sm:$0xff] %v1923_v16  ;;  %1606 = vst [vmem:[#allocation7 + $0xa4] sm:$0xf] %v1904_v17  ;;  %v1914_v20 = vpack.c.bf16 %v2079_v19, %v2079_v19 }
 0x161   :  { %v453_v21 = vpop.f32.mrf.mxu0  ;;  %v748_v22 = vpop.f32.mrf.mxu1 }
 0x162   :  { %1616 = vst [vmem:[#allocation7 + $0xe0] sm:$0xf] %v1914_v20  ;;  %v1925_v24 = vpack.c.bf16 %v453_v21, %v451_v18  ;;  %v1910_v25 = vpack.c.bf16 %v748_v22, %v748_v22 }
 0x163   :  { %v455_v26 = vpop.f32.mrf.mxu0  ;;  %v2080_v27 = vpop.f32.mrf.mxu1 }
 0x164   :  { %1627 = vst [vmem:[#allocation7 + $0x120] sm:$0xff] %v1925_v24  ;;  %1612 = vst [vmem:[#allocation7 + $0xc8] sm:$0xf] %v1910_v25  ;;  %v1916_v28 = vpack.c.bf16 %v2080_v27, %v2080_v27 }
 0x165   :  { %v457_v29 = vpop.f32.mrf.mxu0  ;;  %v751_v30 = vpop.f32.mrf.mxu1 }
 0x166   :  { %1618 = vst [vmem:[#allocation7 + $0xec] sm:$0xf] %v1916_v28  ;;  %v1927_v32 = vpack.c.bf16 %v457_v29, %v455_v26  ;;  %v1912_v33 = vpack.c.bf16 %v751_v30, %v751_v30 }
 0x167   :  { %v461_v34 = vpop.f32.mrf.mxu0  ;;  %v2083_v35 = vpop.f32.mrf.mxu1 }
 0x168   :  { %1629 = vst [vmem:[#allocation7 + $0x12c] sm:$0xff] %v1927_v32  ;;  %1614 = vst [vmem:[#allocation7 + $0xd4] sm:$0xf] %v1912_v33  ;;  %v1922_v36 = vpack.c.bf16 %v2083_v35, %v2083_v35 }
 0x169   :  { %v463_v37 = vpop.f32.mrf.mxu0  ;;  %v764_v38 = vpop.f32.mrf.mxu1 }
 0x16a   :  { %1624 = vst [vmem:[#allocation7 + $0x110] sm:$0xf] %v1922_v36  ;;  %v1929_v40 = vpack.c.bf16 %v463_v37, %v461_v34  ;;  %v1918_v41 = vpack.c.bf16 %v764_v38, %v764_v38 }
 0x16b   :  { %v465_v42 = vpop.f32.mrf.mxu0  ;;  %v2084_v43 = vpop.f32.mrf.mxu1 }
 0x16c   :  { %1631 = vst [vmem:[#allocation7 + $0x138] sm:$0xff] %v1929_v40  ;;  %1620 = vst [vmem:[#allocation7 + $0xf8] sm:$0xf] %v1918_v41  ;;  %v1924_v44 = vpack.c.bf16 %v2084_v43, %v2084_v43 }
 0x16d   :  { %v467_v45 = vpop.f32.mrf.mxu0  ;;  %v767_v46 = vpop.f32.mrf.mxu1 }
 0x16e   :  { %1626 = vst [vmem:[#allocation7 + $0x11c] sm:$0xf] %v1924_v44  ;;  %v1931_v48 = vpack.c.bf16 %v467_v45, %v465_v42  ;;  %v1920_v49 = vpack.c.bf16 %v767_v46, %v767_v46 }
 0x16f   :  { %v471_v50 = vpop.f32.mrf.mxu0  ;;  %v2087_v51 = vpop.f32.mrf.mxu1 }
 0x170   :  { %1633 = vst [vmem:[#allocation7 + $0x144] sm:$0xff] %v1931_v48  ;;  %1622 = vst [vmem:[#allocation7 + $0x104] sm:$0xf] %v1920_v49  ;;  %v1930_v52 = vpack.c.bf16 %v2087_v51, %v2087_v51 }
 0x171   :  { %v473_v53 = vpop.f32.mrf.mxu0  ;;  %v780_v55 = vpop.f32.mrf.mxu1 }
 0x172   :  { %1632 = vst [vmem:[#allocation7 + $0x140] sm:$0xf] %v1930_v52  ;;  %v1933_v56 = vpack.c.bf16 %v473_v53, %v471_v50  ;;  %v1926_v57 = vpack.c.bf16 %v780_v55, %v780_v55 }
 0x173   :  { %v475_v58 = vpop.f32.mrf.mxu0  ;;  %v2088_v59 = vpop.f32.mrf.mxu1 }
 0x174   :  { %1635 = vst [vmem:[#allocation7 + $0x150] sm:$0xff] %v1933_v56  ;;  %1628 = vst [vmem:[#allocation7 + $0x128] sm:$0xf] %v1926_v57  ;;  %v1932_v61 = vpack.c.bf16 %v2088_v59, %v2088_v59 }
 0x175   :  { %v477_v62 = vpop.f32.mrf.mxu0  ;;  %v783_v63 = vpop.f32.mrf.mxu1 }
 0x176   :  { %1634 = vst [vmem:[#allocation7 + $0x14c] sm:$0xf] %v1932_v61  ;;  %v1935_v23 = vpack.c.bf16 %v477_v62, %v475_v58  ;;  %v1928_v31 = vpack.c.bf16 %v783_v63, %v783_v63 }
 0x177   :  { %v481_v39 = vpop.f32.mrf.mxu0  ;;  %v2091_v1 = vpop.f32.mrf.mxu1 }
 0x178   :  { %1637 = vst [vmem:[#allocation7 + $0x15c] sm:$0xff] %v1935_v23  ;;  %1630 = vst [vmem:[#allocation7 + $0x134] sm:$0xf] %v1928_v31  ;;  %v1938_v2 = vpack.c.bf16 %v2091_v1, %v2091_v1 }
 0x179   :  { %v483_v47 = vpop.f32.mrf.mxu0  ;;  %v796_v4 = vpop.f32.mrf.mxu1 }
 0x17a   :  { %1640 = vst [vmem:[#allocation7 + $0x170] sm:$0xf] %v1938_v2  ;;  %v1937_v5 = vpack.c.bf16 %v483_v47, %v481_v39  ;;  %v1934_v54 = vpack.c.bf16 %v796_v4, %v796_v4 }
 0x17b   :  { %v485_v6 = vpop.f32.mrf.mxu0  ;;  %v2092_v60 = vpop.f32.mrf.mxu1 }
 0x17c   :  { %1639 = vst [vmem:[#allocation7 + $0x168] sm:$0xff] %v1937_v5  ;;  %1636 = vst [vmem:[#allocation7 + $0x158] sm:$0xf] %v1934_v54  ;;  %v1940_v7 = vpack.c.bf16 %v2092_v60, %v2092_v60 }
 0x17d   :  { %v487_v0 = vpop.f32.mrf.mxu0  ;;  %v799_v8 = vpop.f32.mrf.mxu1 }
 0x17e   :  { %1642 = vst [vmem:[#allocation7 + $0x17c] sm:$0xf] %v1940_v7  ;;  %v1939_v3 = vpack.c.bf16 %v487_v0, %v485_v6  ;;  %v1936_v9 = vpack.c.bf16 %v799_v8, %v799_v8 }
 0x17f   :  { %v491_v10 = vpop.f32.mrf.mxu0  ;;  %v2095_v11 = vpop.f32.mrf.mxu1 }
 0x180   :  { %1641 = vst [vmem:[#allocation7 + $0x174] sm:$0xff] %v1939_v3  ;;  %1638 = vst [vmem:[#allocation7 + $0x164] sm:$0xf] %v1936_v9  ;;  %v1946_v12 = vpack.c.bf16 %v2095_v11, %v2095_v11 }
 0x181   :  { %v493_v13 = vpop.f32.mrf.mxu0  ;;  %v812_v14 = vpop.f32.mrf.mxu1 }
 0x182   :  { %1648 = vst [vmem:[#allocation7 + $0x1a0] sm:$0xf] %v1946_v12  ;;  %v1941_v15 = vpack.c.bf16 %v493_v13, %v491_v10  ;;  %v1942_v16 = vpack.c.bf16 %v812_v14, %v812_v14 }
 0x183   :  { %v495_v17 = vpop.f32.mrf.mxu0  ;;  %v2096_v18 = vpop.f32.mrf.mxu1 }
 0x184   :  { %1643 = vst [vmem:[#allocation7 + $0x180] sm:$0xff] %v1941_v15  ;;  %1644 = vst [vmem:[#allocation7 + $0x188] sm:$0xf] %v1942_v16  ;;  %v1948_v19 = vpack.c.bf16 %v2096_v18, %v2096_v18 }
 0x185   :  { %v497_v20 = vpop.f32.mrf.mxu0  ;;  %v815_v21 = vpop.f32.mrf.mxu1 }
 0x186   :  { %1650 = vst [vmem:[#allocation7 + $0x1ac] sm:$0xf] %v1948_v19  ;;  %v1943_v22 = vpack.c.bf16 %v497_v20, %v495_v17  ;;  %v1944_v24 = vpack.c.bf16 %v815_v21, %v815_v21 }
 0x187   :  { %v501_v25 = vpop.f32.mrf.mxu0  ;;  %v2099_v26 = vpop.f32.mrf.mxu1 }
 0x188   :  { %1645 = vst [vmem:[#allocation7 + $0x18c] sm:$0xff] %v1943_v22  ;;  %1646 = vst [vmem:[#allocation7 + $0x194] sm:$0xf] %v1944_v24  ;;  %v1954_v27 = vpack.c.bf16 %v2099_v26, %v2099_v26 }
 0x189   :  { %v503_v28 = vpop.f32.mrf.mxu0  ;;  %v828_v29 = vpop.f32.mrf.mxu1 }
 0x18a   :  { %1656 = vst [vmem:[#allocation7 + $0x1d0] sm:$0xf] %v1954_v27  ;;  %v1945_v30 = vpack.c.bf16 %v503_v28, %v501_v25  ;;  %v1950_v32 = vpack.c.bf16 %v828_v29, %v828_v29 }
 0x18b   :  { %v505_v33 = vpop.f32.mrf.mxu0  ;;  %v2100_v34 = vpop.f32.mrf.mxu1 }
 0x18c   :  { %1647 = vst [vmem:[#allocation7 + $0x198] sm:$0xff] %v1945_v30  ;;  %1652 = vst [vmem:[#allocation7 + $0x1b8] sm:$0xf] %v1950_v32  ;;  %v1956_v35 = vpack.c.bf16 %v2100_v34, %v2100_v34 }
 0x18d   :  { %v507_v36 = vpop.f32.mrf.mxu0  ;;  %v831_v37 = vpop.f32.mrf.mxu1 }
 0x18e   :  { %1658 = vst [vmem:[#allocation7 + $0x1dc] sm:$0xf] %v1956_v35  ;;  %v1947_v38 = vpack.c.bf16 %v507_v36, %v505_v33  ;;  %v1952_v40 = vpack.c.bf16 %v831_v37, %v831_v37 }
 0x18f   :  { %v511_v41 = vpop.f32.mrf.mxu0  ;;  %v2103_v42 = vpop.f32.mrf.mxu1 }
 0x190   :  { %1649 = vst [vmem:[#allocation7 + $0x1a4] sm:$0xff] %v1947_v38  ;;  %1654 = vst [vmem:[#allocation7 + $0x1c4] sm:$0xf] %v1952_v40  ;;  %v1962_v43 = vpack.c.bf16 %v2103_v42, %v2103_v42 }
 0x191   :  { %v513_v44 = vpop.f32.mrf.mxu0  ;;  %v844_v45 = vpop.f32.mrf.mxu1 }
 0x192   :  { %1664 = vst [vmem:[#allocation7 + $0x200] sm:$0xf] %v1962_v43  ;;  %v1949_v46 = vpack.c.bf16 %v513_v44, %v511_v41  ;;  %v1958_v48 = vpack.c.bf16 %v844_v45, %v844_v45 }
 0x193   :  { %v515_v49 = vpop.f32.mrf.mxu0  ;;  %v2104_v50 = vpop.f32.mrf.mxu1 }
 0x194   :  { %1651 = vst [vmem:[#allocation7 + $0x1b0] sm:$0xff] %v1949_v46  ;;  %1660 = vst [vmem:[#allocation7 + $0x1e8] sm:$0xf] %v1958_v48  ;;  %v1964_v51 = vpack.c.bf16 %v2104_v50, %v2104_v50 }
 0x195   :  { %v517_v52 = vpop.f32.mrf.mxu0  ;;  %v847_v53 = vpop.f32.mrf.mxu1 }
 0x196   :  { %1666 = vst [vmem:[#allocation7 + $0x20c] sm:$0xf] %v1964_v51  ;;  %v1951_v55 = vpack.c.bf16 %v517_v52, %v515_v49  ;;  %v1960_v56 = vpack.c.bf16 %v847_v53, %v847_v53 }
 0x197   :  { %v521_v57 = vpop.f32.mrf.mxu0  ;;  %v2107_v58 = vpop.f32.mrf.mxu1 }
 0x198   :  { %1653 = vst [vmem:[#allocation7 + $0x1bc] sm:$0xff] %v1951_v55  ;;  %1662 = vst [vmem:[#allocation7 + $0x1f4] sm:$0xf] %v1960_v56  ;;  %v1970_v59 = vpack.c.bf16 %v2107_v58, %v2107_v58 }
 0x199   :  { %v523_v61 = vpop.f32.mrf.mxu0  ;;  %v860_v62 = vpop.f32.mrf.mxu1 }
 0x19a   :  { %1672 = vst [vmem:[#allocation7 + $0x230] sm:$0xf] %v1970_v59  ;;  %v1953_v63 = vpack.c.bf16 %v523_v61, %v521_v57  ;;  %v1966_v23 = vpack.c.bf16 %v860_v62, %v860_v62 }
 0x19b   :  { %v525_v31 = vpop.f32.mrf.mxu0  ;;  %v2108_v39 = vpop.f32.mrf.mxu1 }
 0x19c   :  { %1655 = vst [vmem:[#allocation7 + $0x1c8] sm:$0xff] %v1953_v63  ;;  %1668 = vst [vmem:[#allocation7 + $0x218] sm:$0xf] %v1966_v23  ;;  %v1972_v1 = vpack.c.bf16 %v2108_v39, %v2108_v39 }
 0x19d   :  { %v527_v2 = vpop.f32.mrf.mxu0  ;;  %v863_v47 = vpop.f32.mrf.mxu1 }
 0x19e   :  { %1674 = vst [vmem:[#allocation7 + $0x23c] sm:$0xf] %v1972_v1  ;;  %v1955_v4 = vpack.c.bf16 %v527_v2, %v525_v31  ;;  %v1968_v5 = vpack.c.bf16 %v863_v47, %v863_v47 }
 0x19f   :  { %v531_v54 = vpop.f32.mrf.mxu0  ;;  %v2111_v6 = vpop.f32.mrf.mxu1 }
 0x1a0   :  { %1657 = vst [vmem:[#allocation7 + $0x1d4] sm:$0xff] %v1955_v4  ;;  %1670 = vst [vmem:[#allocation7 + $0x224] sm:$0xf] %v1968_v5  ;;  %v1978_v60 = vpack.c.bf16 %v2111_v6, %v2111_v6 }
 0x1a1   :  { %v533_v7 = vpop.f32.mrf.mxu0  ;;  %v876_v0 = vpop.f32.mrf.mxu1 }
 0x1a2   :  { %1680 = vst [vmem:[#allocation7 + $0x260] sm:$0xf] %v1978_v60  ;;  %v1957_v8 = vpack.c.bf16 %v533_v7, %v531_v54  ;;  %v1974_v3 = vpack.c.bf16 %v876_v0, %v876_v0 }
 0x1a3   :  { %v535_v9 = vpop.f32.mrf.mxu0  ;;  %v2112_v10 = vpop.f32.mrf.mxu1 }
 0x1a4   :  { %1659 = vst [vmem:[#allocation7 + $0x1e0] sm:$0xff] %v1957_v8  ;;  %1676 = vst [vmem:[#allocation7 + $0x248] sm:$0xf] %v1974_v3  ;;  %v1980_v11 = vpack.c.bf16 %v2112_v10, %v2112_v10 }
 0x1a5   :  { %v537_v12 = vpop.f32.mrf.mxu0  ;;  %v879_v13 = vpop.f32.mrf.mxu1 }
 0x1a6   :  { %1682 = vst [vmem:[#allocation7 + $0x26c] sm:$0xf] %v1980_v11  ;;  %v1959_v14 = vpack.c.bf16 %v537_v12, %v535_v9  ;;  %v1976_v15 = vpack.c.bf16 %v879_v13, %v879_v13 }
 0x1a7   :  { %v541_v16 = vpop.f32.mrf.mxu0  ;;  %v2115_v17 = vpop.f32.mrf.mxu1 }
 0x1a8   :  { %1661 = vst [vmem:[#allocation7 + $0x1ec] sm:$0xff] %v1959_v14  ;;  %1678 = vst [vmem:[#allocation7 + $0x254] sm:$0xf] %v1976_v15  ;;  %v1986_v18 = vpack.c.bf16 %v2115_v17, %v2115_v17 }
 0x1a9   :  { %v543_v19 = vpop.f32.mrf.mxu0  ;;  %v892_v20 = vpop.f32.mrf.mxu1 }
 0x1aa   :  { %1688 = vst [vmem:[#allocation7 + $0x290] sm:$0xf] %v1986_v18  ;;  %v1961_v21 = vpack.c.bf16 %v543_v19, %v541_v16  ;;  %v1982_v22 = vpack.c.bf16 %v892_v20, %v892_v20 }
 0x1ab   :  { %v545_v24 = vpop.f32.mrf.mxu0  ;;  %v2116_v25 = vpop.f32.mrf.mxu1 }
 0x1ac   :  { %1663 = vst [vmem:[#allocation7 + $0x1f8] sm:$0xff] %v1961_v21  ;;  %1684 = vst [vmem:[#allocation7 + $0x278] sm:$0xf] %v1982_v22  ;;  %v1988_v26 = vpack.c.bf16 %v2116_v25, %v2116_v25 }
 0x1ad   :  { %v547_v27 = vpop.f32.mrf.mxu0  ;;  %v895_v28 = vpop.f32.mrf.mxu1 }
 0x1ae   :  { %1690 = vst [vmem:[#allocation7 + $0x29c] sm:$0xf] %v1988_v26  ;;  %v1963_v29 = vpack.c.bf16 %v547_v27, %v545_v24  ;;  %v1984_v30 = vpack.c.bf16 %v895_v28, %v895_v28 }
 0x1af   :  { %v551_v32 = vpop.f32.mrf.mxu0  ;;  %v2119_v33 = vpop.f32.mrf.mxu1 }
 0x1b0   :  { %1665 = vst [vmem:[#allocation7 + $0x204] sm:$0xff] %v1963_v29  ;;  %1686 = vst [vmem:[#allocation7 + $0x284] sm:$0xf] %v1984_v30  ;;  %v1994_v34 = vpack.c.bf16 %v2119_v33, %v2119_v33 }
 0x1b1   :  { %v553_v35 = vpop.f32.mrf.mxu0  ;;  %v908_v36 = vpop.f32.mrf.mxu1 }
 0x1b2   :  { %1696 = vst [vmem:[#allocation7 + $0x2c0] sm:$0xf] %v1994_v34  ;;  %v1965_v37 = vpack.c.bf16 %v553_v35, %v551_v32  ;;  %v1990_v38 = vpack.c.bf16 %v908_v36, %v908_v36 }
 0x1b3   :  { %v555_v40 = vpop.f32.mrf.mxu0  ;;  %v2120_v41 = vpop.f32.mrf.mxu1 }
 0x1b4   :  { %1667 = vst [vmem:[#allocation7 + $0x210] sm:$0xff] %v1965_v37  ;;  %1692 = vst [vmem:[#allocation7 + $0x2a8] sm:$0xf] %v1990_v38  ;;  %v1996_v42 = vpack.c.bf16 %v2120_v41, %v2120_v41 }
 0x1b5   :  { %v557_v43 = vpop.f32.mrf.mxu0  ;;  %v911_v44 = vpop.f32.mrf.mxu1 }
 0x1b6   :  { %1698 = vst [vmem:[#allocation7 + $0x2cc] sm:$0xf] %v1996_v42  ;;  %v1967_v45 = vpack.c.bf16 %v557_v43, %v555_v40  ;;  %v1992_v46 = vpack.c.bf16 %v911_v44, %v911_v44 }
 0x1b7   :  { %v561_v48 = vpop.f32.mrf.mxu0  ;;  %v2123_v49 = vpop.f32.mrf.mxu1 }
 0x1b8   :  { %1669 = vst [vmem:[#allocation7 + $0x21c] sm:$0xff] %v1967_v45  ;;  %1694 = vst [vmem:[#allocation7 + $0x2b4] sm:$0xf] %v1992_v46  ;;  %v2002_v50 = vpack.c.bf16 %v2123_v49, %v2123_v49 }
 0x1b9   :  { %v563_v51 = vpop.f32.mrf.mxu0  ;;  %v924_v52 = vpop.f32.mrf.mxu1 }
 0x1ba   :  { %1704 = vst [vmem:[#allocation7 + $0x2f0] sm:$0xf] %v2002_v50  ;;  %v1969_v53 = vpack.c.bf16 %v563_v51, %v561_v48  ;;  %v1998_v55 = vpack.c.bf16 %v924_v52, %v924_v52 }
 0x1bb   :  { %v565_v56 = vpop.f32.mrf.mxu0  ;;  %v2124_v57 = vpop.f32.mrf.mxu1 }
 0x1bc   :  { %1671 = vst [vmem:[#allocation7 + $0x228] sm:$0xff] %v1969_v53  ;;  %1700 = vst [vmem:[#allocation7 + $0x2d8] sm:$0xf] %v1998_v55  ;;  %v2004_v58 = vpack.c.bf16 %v2124_v57, %v2124_v57 }
 0x1bd   :  { %v567_v59 = vpop.f32.mrf.mxu0  ;;  %v927_v61 = vpop.f32.mrf.mxu1 }
 0x1be   :  { %1706 = vst [vmem:[#allocation7 + $0x2fc] sm:$0xf] %v2004_v58  ;;  %v1971_v62 = vpack.c.bf16 %v567_v59, %v565_v56  ;;  %v2000_v63 = vpack.c.bf16 %v927_v61, %v927_v61 }
 0x1c0   :  { %1673 = vst [vmem:[#allocation7 + $0x234] sm:$0xff] %v1971_v62  ;;  %1702 = vst [vmem:[#allocation7 + $0x2e4] sm:$0xf] %v2000_v63 }
 0x1c1   :  { %2232 = shalt.err (!%p2229_p0)
}
 0x1c2   :  { %1718 = dma.vmem_to_hbm [thread:$0]  %s1713_s1, 12288, %s2363_s2, [#allocation4], %s2251_s19, %s2251_s19, %s2252_s20  }
 0x1c3   :  { %2245 = dma.done.wait [#allocation4], 12288  }
 0x1c4   :  { %2246 = vsyncadd [#allocation4], 4294955008 }
 0x1c5   :  { %1722 = vsyncpa [#allocation3], 1 }
 0x1c6   :  { %1723 = vsyncpa [#allocation6], 1 }
 0x1c7   :  { %1724 = vsyncpa [#allocation4], 1 }

</bundles_post_ra>
